<compile_context>
chip_gen: v7x
topology: tpu7x:2x2x1
jax: 0.10.0
libtpu: 0.0.40
codegen_flags: <defaults>
</compile_context>

<pallas_src>
import functools
import math

import jax
import jax.numpy as jnp
from jax.experimental import pallas as pl
from jax.experimental.pallas import tpu as pltpu

EPS = 1e-6


def _round_up(a, b):
    return (a + b - 1) // b * b


def _refine_recip(denom):
    # EUP approximate reciprocal + 2 Newton steps -> full f32 accuracy.
    inv = pl.reciprocal(denom, approx=True)
    inv = inv * (2.0 - denom * inv)
    inv = inv * (2.0 - denom * inv)
    return inv


def _ln_kernel(alpha_ref, beta_ref, x_ref, o_ref, *, d):
    """Plain row LayerNorm over the last axis (W == d, already lane-dense)."""
    x = x_ref[...].astype(jnp.float32)                    # (T, W)
    alpha = alpha_ref[0]
    beta = beta_ref[0]
    mean = jnp.sum(x, axis=-1, keepdims=True) * (1.0 / d)
    xc = x - mean                                          # two-pass variance
    var = jnp.sum(xc * xc, axis=-1, keepdims=True) * (1.0 / (d - 1))
    denom = jnp.sqrt(var) + EPS                            # torch: eps added to std
    inv = _refine_recip(denom)
    o_ref[...] = (xc * (alpha * inv) + beta).astype(o_ref.dtype)


def _ln_seg_kernel(alpha_ref, beta_ref, m_ref, mt_ref, x_ref, o_ref, *, d):
    """Segmented LayerNorm: each W-wide lane row packs G = W//d logical rows.

    Reductions are segmented with MXU matmuls against a block-diagonal
    indicator matrix (no lane relayout / reshape inside the kernel).
    """
    x = x_ref[...].astype(jnp.float32)                     # (T, W)
    m = m_ref[...]                                         # (W, G) gather
    mt = mt_ref[...]                                       # (G, W) scatter
    alpha = alpha_ref[0]
    beta = beta_ref[0]
    mean = jnp.dot(x, m, preferred_element_type=jnp.float32) * (1.0 / d)        # (T, G)
    xc = x - jnp.dot(mean, mt, preferred_element_type=jnp.float32)              # (T, W)
    ss = jnp.dot(xc * xc, m, preferred_element_type=jnp.float32)                # (T, G)
    denom = jnp.sqrt(ss * (1.0 / (d - 1))) + EPS
    inv = _refine_recip(denom)
    scale_full = jnp.dot(alpha * inv, mt, preferred_element_type=jnp.float32)   # (T, W)
    o_ref[...] = (xc * scale_full + beta).astype(o_ref.dtype)


def encoder_forward(x, mask, alpha, beta, *, target_block_bytes=4 * 1024 * 1024):
    """Encoder forward: (empty layer list) -> final LayerNormalization.

    x:     (B, S, D) float array
    mask:  unused when the layer list is empty (kept for signature parity)
    alpha: (1,) scale parameter
    beta:  (1,) shift parameter
    """
    del mask  # no attention layers instantiated -> mask unused
    B, S, D = x.shape
    assert D > 1, "unbiased std needs d_model > 1"
    rows = B * S
    x2d = x.reshape(rows, D)

    # Lane-density fold: W = lcm(D, 128) lanes hold G = W // D logical rows so
    # HBM blocks stream with full-width unmasked `vst` (covers 128 % D == 0,
    # D % 128 == 0, and "odd" widths like 96 / 192).  Fall back to W = D when
    # the fold would be very wide or there are fewer rows than the fold factor.
    w = D * 128 // math.gcd(D, 128)
    g = w // D
    if w > 2048 or rows < g:
        w, g = D, 1

    tail = (-rows) % g
    if tail:
        # Tiny tail pad (< g rows) only when rows isn't a multiple of the fold.
        x2d = jnp.pad(x2d, ((0, tail), (0, 0)))
    rows_g = (rows + tail) // g
    xw = x2d.reshape(rows_g, w)  # contiguous merge-reshape: no data movement

    # Tile sizing: ~4 MiB blocks amortize the ~0.35 us per-grid-step overhead
    # (~85-90% of the HBM roofline on v5e/v6e/v7x) while double-buffered in/out
    # plus the f32 intermediates stay well under v7x's 64 MiB physical VMEM.
    bytes_per_row = w * 4
    tile = max(16, (target_block_bytes // bytes_per_row) // 16 * 16)
    if rows_g <= 16:
        tile = rows_g                                   # single full block
    else:
        # Keep >= 2 grid steps so the "parallel" row axis can shard across the
        # two TensorCores on v7x (no-op on v5e/v6e, which have 1 TC).
        tile = min(tile, max(16, _round_up(pl.cdiv(rows_g, 2), 16)))
    grid = (pl.cdiv(rows_g, tile),)  # partial last block handled by Pallas

    block_bytes = tile * w * 4
    vmem_limit = int(min(48 * 1024 * 1024, max(32 * 1024 * 1024, 10 * block_bytes)))

    if g == 1:
        kernel = functools.partial(_ln_kernel, d=D)
        in_specs = [
            pl.BlockSpec(memory_space=pltpu.MemorySpace.SMEM),   # alpha
            pl.BlockSpec(memory_space=pltpu.MemorySpace.SMEM),   # beta
            pl.BlockSpec((tile, w), lambda i: (i, 0)),           # x rows
        ]
        args = (alpha, beta, xw)
    else:
        # Indicator matrices built once on host; constant index_map keeps them
        # resident in VMEM (no re-DMA, no per-step iota rebuild in the kernel).
        seg = jnp.arange(w, dtype=jnp.int32) // D
        m = (seg[:, None] == jnp.arange(g, dtype=jnp.int32)[None, :]).astype(jnp.float32)
        mt = m.T
        kernel = functools.partial(_ln_seg_kernel, d=D)
        in_specs = [
            pl.BlockSpec(memory_space=pltpu.MemorySpace.SMEM),   # alpha
            pl.BlockSpec(memory_space=pltpu.MemorySpace.SMEM),   # beta
            pl.BlockSpec((w, g), lambda i: (0, 0)),              # gather indicator
            pl.BlockSpec((g, w), lambda i: (0, 0)),              # scatter indicator
            pl.BlockSpec((tile, w), lambda i: (i, 0)),           # x rows
        ]
        args = (alpha, beta, m, mt, xw)

    itemsize = jnp.dtype(x.dtype).itemsize
    cost = pl.CostEstimate(
        flops=int(rows) * D * 8,
        transcendentals=int(rows) * 2,
        bytes_accessed=2 * int(rows_g) * w * itemsize,
    )

    outw = pl.pallas_call(
        kernel,
        out_shape=jax.ShapeDtypeStruct((rows_g, w), x.dtype),
        grid_spec=pl.GridSpec(
            grid=grid,
            in_specs=in_specs,
            out_specs=pl.BlockSpec((tile, w), lambda i: (i, 0)),
        ),
        compiler_params=pltpu.CompilerParams(
            dimension_semantics=("parallel",),  # shard row grid across TCs on v7x
            vmem_limit_bytes=vmem_limit,
        ),
        cost_estimate=cost,
    )(*args)

    out2d = outw.reshape(rows_g * g, D)
    if tail:
        out2d = out2d[:rows]
    return out2d.reshape(B, S, D)


def _reference(x, alpha, beta):
    mean = jnp.mean(x, axis=-1, keepdims=True)
    std = jnp.sqrt(jnp.var(x, axis=-1, keepdims=True, ddof=1))  # unbiased (torch)
    return alpha * (x - mean) / (std + EPS) + beta


if __name__ == "__main__":
    key = jax.random.PRNGKey(0)
    k1, k2, k3, k4 = jax.random.split(key, 4)

    # Parameters matching nn.Parameter(torch.ones(1)) / torch.zeros(1).
    alpha = jnp.ones((1,), dtype=jnp.float32)
    beta = jnp.zeros((1,), dtype=jnp.float32)

    def run_case(k, B, S, D, name):
        x = jax.random.normal(k, (B, S, D), dtype=jnp.float32)
        mask = jnp.ones((B, 1, S, S), dtype=jnp.float32)  # unused (no layers)
        out = jax.block_until_ready(encoder_forward(x, mask, alpha, beta))
        ref = _reference(x, alpha, beta)
        assert out.shape == (B, S, D)
        assert jnp.allclose(out, ref, atol=1e-5, rtol=1e-5), f"mismatch ({name})"

    # Case 1: demo shape, folded path (W=128, G=4).
    run_case(k1, 2, 8, 32, "D=32 fold")
    # Case 2: lane-aligned d_model, G=1, odd row count.
    run_case(k2, 1, 5, 128, "D=128")
    # Case 3: multi-step grid with a partial last block (rows_g=33, tile=32).
    run_case(k3, 4, 33, 32, "D=32 multi-step")
    # Case 4: d_model neither a multiple nor a divisor of 128 (lcm fold, W=384).
    run_case(k4, 2, 8, 96, "D=96 lcm fold")

    print("KERNEL_OK")
</pallas_src>

<mosaic_0001>
module attributes {stable_mosaic.version = 11 : i64} {
  func.func @_ln_seg_kernel(%arg0: i32, %arg1: memref<1xf32, #tpu.memory_space<smem>>, %arg2: memref<1xf32, #tpu.memory_space<smem>>, %arg3: memref<128x4xf32, #tpu.memory_space<vmem>>, %arg4: memref<4x128xf32, #tpu.memory_space<vmem>>, %arg5: memref<4x128xf32, #tpu.memory_space<vmem>>, %arg6: memref<4x128xf32, #tpu.memory_space<vmem>>) attributes {dimension_semantics = [#tpu.dimension_semantics<parallel>], iteration_bounds = array<i64: 1>, scalar_prefetch = 0 : i64, scratch_operands = 0 : i64, tpu.core_type = #tpu.core_type<tc>, window_params = [{transform_indices = @transform_0, window_bounds = array<i64: 1>}, {transform_indices = @transform_1, window_bounds = array<i64: 1>}, {pipeline_mode = #tpu.pipeline_mode<synchronous>, transform_indices = @transform_2, window_bounds = array<i64: 128, 4>}, {pipeline_mode = #tpu.pipeline_mode<synchronous>, transform_indices = @transform_3, window_bounds = array<i64: 4, 128>}, {transform_indices = @transform_4, window_bounds = array<i64: 4, 128>}, {transform_indices = @transform_5, window_bounds = array<i64: 4, 128>}]} {
    %c0 = arith.constant 0 : index
    %c0_0 = arith.constant 0 : index
    %0 = vector.load %arg5[%c0, %c0_0] : memref<4x128xf32, #tpu.memory_space<vmem>>, vector<4x128xf32>
    %c0_1 = arith.constant 0 : index
    %c0_2 = arith.constant 0 : index
    %1 = vector.load %arg3[%c0_1, %c0_2] : memref<128x4xf32, #tpu.memory_space<vmem>>, vector<128x4xf32>
    %c0_3 = arith.constant 0 : index
    %c0_4 = arith.constant 0 : index
    %2 = vector.load %arg4[%c0_3, %c0_4] : memref<4x128xf32, #tpu.memory_space<vmem>>, vector<4x128xf32>
    %c0_5 = arith.constant 0 : index
    %3 = memref.load %arg1[%c0_5] : memref<1xf32, #tpu.memory_space<smem>>
    %c0_6 = arith.constant 0 : index
    %4 = memref.load %arg2[%c0_6] : memref<1xf32, #tpu.memory_space<smem>>
    %cst = arith.constant dense<0.000000e+00> : vector<4x4xf32>
    %5 = tpu.matmul %0, %1, %cst {dimension_numbers = #tpu.dot_dimension_numbers<[1], [0], [0], [1], [0, 0, 1, 1], [], []>} : vector<4x128xf32>, vector<128x4xf32>, vector<4x4xf32> -> vector<4x4xf32>
    %cst_7 = arith.constant 3.125000e-02 : f32
    %6 = vector.broadcast %cst_7 : f32 to vector<4x4xf32>
    %7 = arith.mulf %5, %6 : vector<4x4xf32>
    %cst_8 = arith.constant dense<0.000000e+00> : vector<4x128xf32>
    %8 = tpu.matmul %7, %2, %cst_8 {dimension_numbers = #tpu.dot_dimension_numbers<[1], [0], [0], [1], [0, 0, 1, 1], [], []>} : vector<4x4xf32>, vector<4x128xf32>, vector<4x128xf32> -> vector<4x128xf32>
    %9 = arith.subf %0, %8 : vector<4x128xf32>
    %10 = arith.mulf %9, %9 : vector<4x128xf32>
    %cst_9 = arith.constant dense<0.000000e+00> : vector<4x4xf32>
    %11 = tpu.matmul %10, %1, %cst_9 {dimension_numbers = #tpu.dot_dimension_numbers<[1], [0], [0], [1], [0, 0, 1, 1], [], []>} : vector<4x128xf32>, vector<128x4xf32>, vector<4x4xf32> -> vector<4x4xf32>
    %cst_10 = arith.constant 0.0322580636 : f32
    %12 = vector.broadcast %cst_10 : f32 to vector<4x4xf32>
    %13 = arith.mulf %11, %12 : vector<4x4xf32>
    %14 = math.sqrt %13 : vector<4x4xf32>
    %cst_11 = arith.constant 9.99999997E-7 : f32
    %15 = vector.broadcast %cst_11 : f32 to vector<4x4xf32>
    %16 = arith.addf %14, %15 : vector<4x4xf32>
    %17 = tpu.reciprocal %16 {approx = true} : vector<4x4xf32> -> vector<4x4xf32>
    %18 = arith.mulf %16, %17 : vector<4x4xf32>
    %cst_12 = arith.constant 2.000000e+00 : f32
    %19 = vector.broadcast %cst_12 : f32 to vector<4x4xf32>
    %20 = arith.subf %19, %18 : vector<4x4xf32>
    %21 = arith.mulf %17, %20 : vector<4x4xf32>
    %22 = arith.mulf %16, %21 : vector<4x4xf32>
    %cst_13 = arith.constant 2.000000e+00 : f32
    %23 = vector.broadcast %cst_13 : f32 to vector<4x4xf32>
    %24 = arith.subf %23, %22 : vector<4x4xf32>
    %25 = arith.mulf %21, %24 : vector<4x4xf32>
    %26 = vector.broadcast %3 : f32 to vector<4x4xf32>
    %27 = arith.mulf %26, %25 : vector<4x4xf32>
    %cst_14 = arith.constant dense<0.000000e+00> : vector<4x128xf32>
    %28 = tpu.matmul %27, %2, %cst_14 {dimension_numbers = #tpu.dot_dimension_numbers<[1], [0], [0], [1], [0, 0, 1, 1], [], []>} : vector<4x4xf32>, vector<4x128xf32>, vector<4x128xf32> -> vector<4x128xf32>
    %29 = arith.mulf %9, %28 : vector<4x128xf32>
    %30 = vector.broadcast %4 : f32 to vector<4x128xf32>
    %31 = arith.addf %29, %30 : vector<4x128xf32>
    %c0_15 = arith.constant 0 : index
    %c0_16 = arith.constant 0 : index
    %32 = vector.load %arg6[%c0_15, %c0_16] : memref<4x128xf32, #tpu.memory_space<vmem>>, vector<4x128xf32>
    tpu.vector_store %arg6[%c0_15, %c0_16], %31 {strides = array<i32>} : memref<4x128xf32, #tpu.memory_space<vmem>>, vector<4x128xf32>,
    return
  }
  func.func @transform_0(%arg0: i32) -> i32 {
    %c0_i32 = arith.constant 0 : i32
    %c0_i32_0 = arith.constant 0 : i32
    return %c0_i32 : i32
  }
  func.func @transform_1(%arg0: i32) -> i32 {
    %c0_i32 = arith.constant 0 : i32
    %c0_i32_0 = arith.constant 0 : i32
    return %c0_i32 : i32
  }
  func.func @transform_2(%arg0: i32) -> (i32, i32) {
    %c0_i32 = arith.constant 0 : i32
    %c0_i32_0 = arith.constant 0 : i32
    %c0_i32_1 = arith.constant 0 : i32
    return %c0_i32, %c0_i32_0 : i32, i32
  }
  func.func @transform_3(%arg0: i32) -> (i32, i32) {
    %c0_i32 = arith.constant 0 : i32
    %c0_i32_0 = arith.constant 0 : i32
    %c0_i32_1 = arith.constant 0 : i32
    return %c0_i32, %c0_i32_0 : i32, i32
  }
  func.func @transform_4(%arg0: i32) -> (i32, i32) {
    %c0_i32 = arith.constant 0 : i32
    %c0_i32_0 = arith.constant 0 : i32
    return %arg0, %c0_i32 : i32, i32
  }
  func.func @transform_5(%arg0: i32) -> (i32, i32) {
    %c0_i32 = arith.constant 0 : i32
    %c0_i32_0 = arith.constant 0 : i32
    return %arg0, %c0_i32 : i32, i32
  }
}

</mosaic_0001>

<bundles_post_ra>
// kernel: tpu_custom_call.1
= control target key start
LH: loop header
LB: loop body
LE: loop exit
PB: predicated region body
PF: predicated region fallthrough
CT: control target
= control target key end

     0   :  { %v575_v3 = vmov 0.0|0.0   ;;  %vm576_vm0 = vmmov 0   ;;  %v577_v6 = vmov 0.0   ;;  %s703_s0 = inlined_call_operand.<no memory space> [shape: f32[1], index: 0, kind: input, shape index: {}]   ;;  %s704_s1 = inlined_call_operand.<no memory space> [shape: f32[1], index: 1, kind: input, shape index: {}]   ;;  %s705_s2 = inlined_call_operand.vmem [shape: f32[128,4], index: 2, kind: input, shape index: {}]   ;;  %s706_s3 = inlined_call_operand.vmem [shape: f32[4,128], index: 3, kind: input, shape index: {}]   ;;  %s707_s4 = inlined_call_operand.vmem [shape: f32[4,128], index: 4, kind: input, shape index: {}]   ;;  %s708_s5 = inlined_call_operand.hbm [shape: f32[4,128], index: 5, kind: output, shape index: {}]  }
   0x1   :  { %v24_v0 = vld [vmem:[%s705_s2] sm:$0xff]  ;;  %v25_v1 = vld [vmem:[%s705_s2 + $0x8] sm:$0xff]  ;;  %v26_v2 = vld [vmem:[%s705_s2 + $0x10] sm:$0xff]  ;;  %495 = vmatprep.subr.bf16.mxu0 %v575_v3  ;;  %447 = vmatprep.mubr.msk.f32.mxu0 %vm576_vm0, %v577_v6 }
   0x2   :  { %v496_v4 = vpack.c.bf16 %v25_v1, %v24_v0  ;;  %v27_v5 = vld [vmem:[%s705_s2 + $0x18] sm:$0xff]  ;;  %450 = vmatprep.subr.mxu1 %v577_v6  ;;  %452 = vmatprep.mubr.msk.f32.mxu1 %vm576_vm0, %v577_v6  ;;  %v28_v8 = vld [vmem:[%s705_s2 + $0x20] sm:$0xff]  ;;  %v29_v9 = vld [vmem:[%s705_s2 + $0x28] sm:$0xff] }
   0x3   :  { %v499_v7 = vpack.c.bf16 %v27_v5, %v26_v2 }
   0x4   :  { %497 = vmatpush3.bf16.msra.mxu0 %v496_v4 }
   0x5   :  { %498 = vmatprep.subr.bf16.mxu0 %v575_v3 }
   0x6   :  { %12 = vsyncpa [#allocation5], 0  ;;  %v502_v10 = vpack.c.bf16 %v29_v9, %v28_v8  ;;  %v30_v11 = vld [vmem:[%s705_s2 + $0x30] sm:$0xff]  ;;  %v31_v12 = vld [vmem:[%s705_s2 + $0x38] sm:$0xff]  ;;  %vm118_vm1 = vcmask 1043456   ;;  %vm114_vm2 = vcmask 31744   ;;  %v280_v50 = vstv %s703_s0 }
   0x7   :  { %v505_v13 = vpack.c.bf16 %v31_v12, %v30_v11  ;;  %v32_v14 = vld [vmem:[%s705_s2 + $0x40] sm:$0xff]  ;;  %v33_v15 = vld [vmem:[%s705_s2 + $0x48] sm:$0xff]  ;;  %v34_v17 = vld [vmem:[%s705_s2 + $0x50] sm:$0xff]  ;;  %v356_v54 = vstv %s704_s1  ;;  %s578_s30 = smov [#allocation4]  }
   0x8   :  { %500 = vmatpush3.bf16.msra.mxu0 %v499_v7  ;;  %v508_v16 = vpack.c.bf16 %v33_v15, %v32_v14  ;;  %v35_v18 = vld [vmem:[%s705_s2 + $0x58] sm:$0xff]  ;;  %v36_v20 = vld [vmem:[%s705_s2 + $0x60] sm:$0xff]  ;;  %v37_v21 = vld [vmem:[%s705_s2 + $0x68] sm:$0xff]  ;;  %s365_s6 = sshll.u32 %s578_s30, 4  ;;  %s366_s6 = int_to_ptr.vmem [resolvable:$true] %s365_s6 }
   0x9   :  { %501 = vmatprep.subr.bf16.mxu0 %v575_v3  ;;  %v511_v19 = vpack.c.bf16 %v35_v18, %v34_v17  ;;  %v514_v22 = vpack.c.bf16 %v37_v21, %v36_v20  ;;  %v38_v23 = vld [vmem:[%s705_s2 + $0x70] sm:$0xff]  ;;  %v39_v24 = vld [vmem:[%s705_s2 + $0x78] sm:$0xff]  ;;  %v23_v26 = vld [vmem:[%s707_s4] sm:$0xf]  ;;  %s551_s7 = scalar_lea.vmem %s366_s6, 64  ;;  %p556_p1 = scmp.lt.s32.totalorder %s366_s6, %s366_s6 }
   0xa   :  { %v517_v25 = vpack.c.bf16 %v39_v24, %v38_v23  ;;  %v40_v27 = vld [vmem:[%s706_s3] sm:$0xf]  ;;  %p552_p0 = scmp.ne.s32.totalorder %s366_s6, %s551_s7  ;;  %p557_p2 = scmp.lt.s32.totalorder %s551_s7, %s551_s7 }
   0xb   :  { %451 = vmatpush3.msk.msra.mxu1 %vm118_vm1, %v40_v27 }
   0xc   :  { %503 = vmatpush3.bf16.msra.mxu0 %v502_v10  ;;  %519 = vmatprep.subr.bf16.mxu1 %v575_v3  ;;  %p558_p3 = por %p557_p2, %p556_p1 }
   0xd   :  { %504 = vmatprep.subr.bf16.mxu0 %v575_v3 }
   0xe   :  { %p559_p4 = pnand %p558_p3, %p552_p0 }
  0x10   :  { %506 = vmatpush3.bf16.msra.mxu0 %v505_v13 }
  0x11   :  { %507 = vmatprep.subr.bf16.mxu0 %v575_v3 }
  0x14   :  { %509 = vmatpush3.bf16.msra.mxu0 %v508_v16 }
  0x15   :  { %510 = vmatprep.subr.bf16.mxu0 %v575_v3 }
  0x18   :  { %512 = vmatpush3.bf16.msra.mxu0 %v511_v19 }
  0x19   :  { %513 = vmatprep.subr.bf16.mxu0 %v575_v3 }
  0x1c   :  { %515 = vmatpush3.bf16.msra.mxu0 %v514_v22 }
  0x1d   :  { %516 = vmatprep.subr.bf16.mxu0 %v575_v3 }
  0x20   :  { %518 = vmatpush3.bf16.msra.mxu0 %v517_v25 }
  0x21   :  { %490 = vmatprep.subr.mxu0 %v577_v6 }
  0x23   :  { %448 = vmatmul.mubr.f32.vlgmr.msra.gmra.mrb[0].mxu0 %v23_v26 }
  0x24   :  { %492 = vmatprep.mubr.msk.f32.mxu0 %vm576_vm0, %v577_v6  ;;  %491 = vmatpush3.msk.msra.mxu0 %vm118_vm1, %v40_v27 }
  0xf6   :  { %v109_v28 = vpop.f32.mrb[0].mxu0 }
  0xf7   :  { %v113_v29 = vmul.f32 0.03125, %v109_v28  ;;  %v449_v30 = vpop.f32.mrb[1].mxu0 }
  0xf9   :  { %453 = vmatmul.mubr.msk.f32.vlgmr.msra.gmra.mrb[0].mxu1 %vm114_vm2, %v113_v29 }
  0xfa   :  { %521 = vmatpush3.bf16.msra.mxu1 %v496_v4  ;;  %487 = vmatprep.mubr.msk.f32.mxu1 %vm576_vm0, %v577_v6 }
  0xfb   :  { %522 = vmatprep.subr.bf16.mxu1 %v575_v3 }
  0xfe   :  { %524 = vmatpush3.bf16.msra.mxu1 %v499_v7 }
  0xff   :  { %525 = vmatprep.subr.bf16.mxu1 %v575_v3 }
 0x102   :  { %527 = vmatpush3.bf16.msra.mxu1 %v502_v10 }
 0x103   :  { %528 = vmatprep.subr.bf16.mxu1 %v575_v3 }
 0x106   :  { %530 = vmatpush3.bf16.msra.mxu1 %v505_v13 }
 0x107   :  { %531 = vmatprep.subr.bf16.mxu1 %v575_v3 }
 0x10a   :  { %533 = vmatpush3.bf16.msra.mxu1 %v508_v16 }
 0x10b   :  { %534 = vmatprep.subr.bf16.mxu1 %v575_v3 }
 0x10e   :  { %536 = vmatpush3.bf16.msra.mxu1 %v511_v19 }
 0x10f   :  { %537 = vmatprep.subr.bf16.mxu1 %v575_v3 }
 0x112   :  { %539 = vmatpush3.bf16.msra.mxu1 %v514_v22 }
 0x113   :  { %540 = vmatprep.subr.bf16.mxu1 %v575_v3 }
 0x116   :  { %542 = vmatpush3.bf16.msra.mxu1 %v517_v25 }
 0x1cc   :  { %v188_v31 = vpop.f32.mrb[0].mxu1 }
 0x1cd   :  { %v192_v32 = vsub.f32 %v23_v26, %v188_v31  ;;  %v454_v33 = vpop.f32.mrb[1].mxu1 }
 0x1cf   :  { %v193_v34 = vmul.f32 %v192_v32, %v192_v32 }
 0x1d1   :  { %488 = vmatmul.mubr.f32.vlgmr.msra.gmra.mrb[2].mxu1 %v193_v34 }
 0x2a4   :  { %v260_v35 = vpop.f32.mrb[2].mxu1 }
 0x2a5   :  { %v264_v36 = vmul.f32 0.032258064, %v260_v35  ;;  %v489_v37 = vpop.f32.mrb[3].mxu1 }
 0x2a7   :  { %547 = vrsqrt.f32 %v264_v36  ;;  %vm267_vm3 = vcmp.eq.f32.partialorder %v264_v36, inf  ;;  %v270_v40 = vand.u32 2147483648, %v264_v36  ;;  %vm269_vm4 = vcmp.eq.f32.partialorder %v264_v36, 0.0 }
 0x2b1   :  { %v548_v38 = vpop.eup %547 }
 0x2b2   :  { %v266_v39 = vmul.f32 %v548_v38, %v264_v36 }
 0x2b4   :  { %v268_v41 = vsel %vm267_vm3, %v264_v36, %v266_v39 }
 0x2b5   :  { %v271_v42 = vsel %vm269_vm4, %v270_v40, %v268_v41 }
 0x2b6   :  { %v272_v43 = vadd.f32 1e-06, %v271_v42 }
 0x2b8   :  { %549 = vrcp.f32 %v272_v43 }
 0x2c2   :  { %v550_v44 = vpop.eup %549 }
 0x2c3   :  { %v274_v45 = vmul.f32 %v550_v44, %v272_v43 }
 0x2c5   :  { %v275_v46 = vsub.f32 2.0, %v274_v45 }
 0x2c7   :  { %v276_v47 = vmul.f32 %v550_v44, %v275_v46 }
 0x2c9   :  { %v277_v48 = vmul.f32 %v276_v47, %v272_v43 }
 0x2cb   :  { %v278_v49 = vsub.f32 2.0, %v277_v48 }
 0x2cd   :  { %v279_v51 = vmul.f32 %v278_v49, %v276_v47 }
 0x2cf   :  { %v281_v52 = vmul.f32 %v280_v50, %v279_v51 }
 0x2d1   :  { %493 = vmatmul.mubr.msk.f32.vlgmr.msra.gmra.mrb[2].mxu0 %vm114_vm2, %v281_v52 }
 0x3a4   :  { %v351_v53 = vpop.f32.mrb[2].mxu0 }
 0x3a5   :  { %v355_v55 = vmul.f32 %v351_v53, %v192_v32  ;;  %v494_v56 = vpop.f32.mrb[3].mxu0 }
 0x3a7   :  { %v357_v57 = vadd.f32 %v356_v54, %v355_v55 }
 0x3a9   :  { %358 = vst [vmem:[#allocation4] sm:$0xf] %v357_v57 }
 0x3aa   :  { %562 = shalt.err (!%p559_p4)
}
 0x3ab   :  { %s563_s9 = scalar_lea.hbm %s708_s5, 64 }
 0x3ac   :  { %p564_p5 = scmp.ne.s32.totalorder %s708_s5, %s563_s9  ;;  %p567_p6 = scmp.lt.u32.totalorder %s563_s9, %s708_s5 }
 0x3ae   :  { %p569_p7 = pnand %p567_p6, %p564_p5 }
 0x3b0   :  { %572 = shalt.err (!%p569_p7)
}
 0x3b1   :  { %368 = dma.vmem_to_hbm [thread:$0]  %s366_s6, 64, %s708_s5, [#allocation5]  }
 0x3b2   :  { %573 = dma.done.wait [#allocation5], 64  }
 0x3b3   :  { %574 = vsyncadd [#allocation5], 4294967232 }
 0x3b4   :  { %372 = vsyncpa [#allocation5], 1 }

</bundles_post_ra>
